<compile_context>
chip_gen: v7x
topology: tpu7x:2x2x1
jax: 0.10.0
libtpu: 0.0.40
codegen_flags: <defaults>
</compile_context>

<pallas_src>
import functools

import jax
import jax.numpy as jnp
from jax import lax
from jax.experimental import pallas as pl
from jax.experimental.pallas import tpu as pltpu


_SQRT_HALF = 0.7071067811865476  # 1/sqrt(2)


def _gelu(x, approximate):
    if approximate:
        # tanh-approx GELU goes to the EUP slot (frees VALU on v6e/v7x).
        return jax.nn.gelu(x, approximate=True)
    # PyTorch nn.GELU() default = exact erf-based GELU.
    return 0.5 * x * (1.0 + lax.erf(x * _SQRT_HALF))


def _round_up(a, b):
    return (a + b - 1) // b * b


def _sublane_multiple(dtype):
    # 8 sublanes x packing factor: 8 for f32, 16 for bf16, 32 for int8/fp8.
    return max(8, 32 // jnp.dtype(dtype).itemsize)


def _tpu_defaults():
    """Generation-aware defaults: token tile, VMEM cap, TensorCores, MXU align."""
    gen = 6
    try:
        kind = jax.devices()[0].device_kind.lower()
        for g in (7, 6, 5, 4):
            if (f"v{g}" in kind) or (f"{g}x" in kind):
                gen = g
                break
    except Exception:
        pass
    if gen >= 7:
        # 64 MiB physical VMEM/TC -> leave headroom; 2 TensorCores per chip.
        return dict(tm=512, vmem_cap=48 << 20, n_cores=2, mxu_align=256)
    if gen == 6:
        # HBM-bound unless tm is large; 128 MiB physical VMEM.
        return dict(tm=1024, vmem_cap=100 << 20, n_cores=1, mxu_align=256)
    # v5e and older: 4x128^2 MXU, 128 MiB VMEM.
    return dict(tm=512, vmem_cap=100 << 20, n_cores=1, mxu_align=128)


# ---------------------------------------------------------------------------
# Kernels
# ---------------------------------------------------------------------------

def _mlp_kernel_resident(x_ref, w1_ref, b1_ref, w2_ref, b2_ref, o_ref, *, approximate):
    # Fast path: full W1/W2 resident in VMEM, grid = (M tiles,).
    h = jnp.dot(x_ref[...], w1_ref[...], preferred_element_type=jnp.float32)
    h = _gelu(h + b1_ref[...], approximate)
    out = jnp.dot(h.astype(w2_ref.dtype), w2_ref[...],
                  preferred_element_type=jnp.float32)
    o_ref[...] = (out + b2_ref[...]).astype(o_ref.dtype)


def _mlp_kernel_tiled_inplace(x_ref, w1_ref, b1_ref, w2_ref, b2_ref, o_ref, *, approximate):
    # Tiled path, f32 output: accumulate directly into the VMEM-resident
    # output block (block index constant across the H axis), no scratch.
    k = pl.program_id(1)

    @pl.when(k == 0)
    def _():
        o_ref[...] = jnp.broadcast_to(b2_ref[...], o_ref.shape).astype(o_ref.dtype)

    h = jnp.dot(x_ref[...], w1_ref[...], preferred_element_type=jnp.float32)
    h = _gelu(h + b1_ref[...], approximate)
    o_ref[...] += jnp.dot(h.astype(w2_ref.dtype), w2_ref[...],
                          preferred_element_type=jnp.float32)


def _mlp_kernel_tiled_scratch(x_ref, w1_ref, b1_ref, w2_ref, b2_ref, o_ref, acc_ref, *, approximate):
    # Tiled path, non-f32 output: f32 accumulator scratch, single final cast.
    k = pl.program_id(1)

    @pl.when(k == 0)
    def _():
        acc_ref[...] = jnp.zeros_like(acc_ref)

    h = jnp.dot(x_ref[...], w1_ref[...], preferred_element_type=jnp.float32)
    h = _gelu(h + b1_ref[...], approximate)
    acc_ref[...] += jnp.dot(h.astype(w2_ref.dtype), w2_ref[...],
                            preferred_element_type=jnp.float32)

    @pl.when(k == pl.num_programs(1) - 1)
    def _():
        o_ref[...] = (acc_ref[...] + b2_ref[...]).astype(o_ref.dtype)


# ---------------------------------------------------------------------------
# Wrapper
# ---------------------------------------------------------------------------

def mlp_pallas(x, w1, b1, w2, b2, *, tm=None, th=512, compute_dtype=None,
               approximate_gelu=False, force_path=None):
    """x: (B, N, D_in). Weights stored (in_features, out_features). Returns (B, N, D_out)."""
    B, N, D_in = x.shape
    assert w1.shape[0] == D_in
    H = w1.shape[1]
    assert w2.shape[0] == H
    D_out = w2.shape[1]

    out_dtype = x.dtype

    defaults = _tpu_defaults()
    if tm is None:
        tm = defaults["tm"]
    vmem_cap = defaults["vmem_cap"]
    n_cores = defaults["n_cores"]
    align = defaults["mxu_align"]

    # bf16 inputs -> bf16 MXU compute (f32 accumulation); f32 stays f32.
    if compute_dtype is None:
        compute_dtype = jnp.bfloat16 if x.dtype == jnp.bfloat16 else x.dtype
    x = x.astype(compute_dtype)
    w1 = w1.astype(compute_dtype)
    w2 = w2.astype(compute_dtype)
    # Biases stay f32 (added on the f32-accumulated matmul results).
    b1 = b1.astype(jnp.float32)
    b2 = b2.astype(jnp.float32)

    w_bytes = jnp.dtype(compute_dtype).itemsize
    out_bytes = jnp.dtype(out_dtype).itemsize
    sub = _sublane_multiple(compute_dtype)

    M = B * N
    x2d = x.reshape(M, D_in)

    # ---- token-axis tiling: clamp tile for tiny inputs, pad instead of assert.
    tm_eff = min(tm, _round_up(M, sub))
    # On 2-TC parts (v7x), make sure the "parallel" M axis has >= 2 tiles
    # when M is large enough, so both TensorCores get work.
    if n_cores >= 2 and _round_up(M, tm_eff) // tm_eff < 2 and M >= 2 * max(sub, 128):
        tm_eff = _round_up((M + 1) // 2, sub)
    Mp = _round_up(M, tm_eff)
    if Mp != M:
        x2d = jnp.pad(x2d, ((0, Mp - M), (0, 0)))
    n_m_tiles = Mp // tm_eff

    # ---- fast path feasibility: everything (weights double-buffered worst
    # case + tiles + f32 intermediates) must fit with headroom under the cap.
    fast_vmem = (
        2 * tm_eff * D_in * w_bytes        # x tile
        + 2 * D_in * H * w_bytes           # full W1
        + 2 * H * 4                        # b1
        + 2 * H * D_out * w_bytes          # full W2
        + 2 * D_out * 4                    # b2
        + 2 * tm_eff * D_out * out_bytes   # out tile
        + tm_eff * H * 4                   # fc1/GELU intermediate (f32)
        + tm_eff * D_out * 4               # fc2 f32 result before cast
    )
    use_fast = fast_vmem <= int(0.70 * vmem_cap)
    if force_path == "fast":
        use_fast = True
    elif force_path == "tiled":
        use_fast = False

    if use_fast:
        # ------------------ weights-resident fast path ------------------
        Hp = H
        grid = (n_m_tiles,)
        kernel = functools.partial(_mlp_kernel_resident, approximate=approximate_gelu)
        in_specs = [
            pl.BlockSpec((tm_eff, D_in), lambda i: (i, 0)),   # x tile
            pl.BlockSpec((D_in, H), lambda i: (0, 0)),        # W1: fetched once
            pl.BlockSpec((1, H), lambda i: (0, 0)),           # b1: fetched once
            pl.BlockSpec((H, D_out), lambda i: (0, 0)),       # W2: fetched once
            pl.BlockSpec((1, D_out), lambda i: (0, 0)),       # b2: fetched once
        ]
        out_specs = pl.BlockSpec((tm_eff, D_out), lambda i: (i, 0))
        scratch_shapes = []
        dim_sem = ("parallel",)
        operands = (x2d, w1, b1.reshape(1, H), w2, b2.reshape(1, D_out))
        vmem_est = fast_vmem
        weight_passes = 1
    else:
        # ------------------ hidden-dim tiled fallback ------------------
        th_eff = max(align, (min(th, H) // align) * align)
        Hp = _round_up(H, th_eff)
        if Hp != H:
            # Zero-padded hidden units contribute exactly zero to fc2.
            w1 = jnp.pad(w1, ((0, 0), (0, Hp - H)))
            b1 = jnp.pad(b1, ((0, Hp - H),))
            w2 = jnp.pad(w2, ((0, Hp - H), (0, 0)))
        n_h = Hp // th_eff
        grid = (n_m_tiles, n_h)
        in_specs = [
            pl.BlockSpec((tm_eff, D_in), lambda i, k: (i, 0)),    # x tile
            pl.BlockSpec((D_in, th_eff), lambda i, k: (0, k)),    # W1 slice
            pl.BlockSpec((1, th_eff), lambda i, k: (0, k)),       # b1 slice
            pl.BlockSpec((th_eff, D_out), lambda i, k: (k, 0)),   # W2 slice
            pl.BlockSpec((1, D_out), lambda i, k: (0, 0)),        # b2
        ]
        out_specs = pl.BlockSpec((tm_eff, D_out), lambda i, k: (i, 0))
        if out_dtype == jnp.float32:
            kernel = functools.partial(_mlp_kernel_tiled_inplace,
                                       approximate=approximate_gelu)
            scratch_shapes = []
        else:
            kernel = functools.partial(_mlp_kernel_tiled_scratch,
                                       approximate=approximate_gelu)
            scratch_shapes = [pltpu.VMEM((tm_eff, D_out), jnp.float32)]
        dim_sem = ("parallel", "arbitrary")
        operands = (x2d, w1, b1.reshape(1, Hp), w2, b2.reshape(1, D_out))
        vmem_est = (
            2 * tm_eff * D_in * w_bytes
            + 2 * D_in * th_eff * w_bytes
            + 2 * th_eff * 4
            + 2 * th_eff * D_out * w_bytes
            + 2 * D_out * 4
            + 2 * tm_eff * D_out * out_bytes
            + tm_eff * th_eff * 4
            + tm_eff * D_out * 4
        )
        weight_passes = n_m_tiles

    # ---- VMEM budget: headroom over the double-buffered estimate, capped
    # below physical (48 MiB on v7x, ~100 MiB on v5e/v6e).
    vmem_limit = int(min(max(2 * vmem_est, 32 << 20), vmem_cap))

    cost = pl.CostEstimate(
        flops=2 * M * (D_in * H + H * D_out),
        transcendentals=M * H,  # erf/tanh per hidden activation
        bytes_accessed=int(
            M * D_in * w_bytes
            + weight_passes * (D_in * Hp + Hp * D_out) * w_bytes
            + (Hp + D_out) * 4
            + M * D_out * out_bytes
        ),
    )

    out2d = pl.pallas_call(
        kernel,
        out_shape=jax.ShapeDtypeStruct((Mp, D_out), out_dtype),
        grid_spec=pltpu.PrefetchScalarGridSpec(
            num_scalar_prefetch=0,
            grid=grid,
            in_specs=in_specs,
            out_specs=out_specs,
            scratch_shapes=scratch_shapes,
        ),
        compiler_params=pltpu.CompilerParams(
            dimension_semantics=dim_sem,
            vmem_limit_bytes=vmem_limit,
        ),
        cost_estimate=cost,
    )(*operands)

    return out2d[:M].reshape(B, N, D_out)


def mlp_reference(x, w1, b1, w2, b2):
    h = jnp.dot(x, w1) + b1
    h = 0.5 * h * (1.0 + lax.erf(h * _SQRT_HALF))
    return jnp.dot(h, w2) + b2


if __name__ == "__main__":
    # Small shapes consistent with a ViT MLP block:
    #   batch=2, seq=8, in_features=32, hidden_features=64, out_features=32
    B, N, D_in, H, D_out = 2, 8, 32, 64, 32

    key = jax.random.PRNGKey(0)
    kx, kw1, kb1, kw2, kb2 = jax.random.split(key, 5)

    x = jax.random.normal(kx, (B, N, D_in), dtype=jnp.float32)

    # Deterministic parameter init (mimicking nn.Linear's uniform fan-in init).
    lim1 = 1.0 / jnp.sqrt(D_in)
    lim2 = 1.0 / jnp.sqrt(H)
    w1 = jax.random.uniform(kw1, (D_in, H), minval=-lim1, maxval=lim1, dtype=jnp.float32)
    b1 = jax.random.uniform(kb1, (H,), minval=-lim1, maxval=lim1, dtype=jnp.float32)
    w2 = jax.random.uniform(kw2, (H, D_out), minval=-lim2, maxval=lim2, dtype=jnp.float32)
    b2 = jax.random.uniform(kb2, (D_out,), minval=-lim2, maxval=lim2, dtype=jnp.float32)

    ref = mlp_reference(x, w1, b1, w2, b2)

    # 1) Default path (weights-resident fast path at these sizes).
    out_fast = jax.block_until_ready(mlp_pallas(x, w1, b1, w2, b2))
    assert out_fast.shape == (B, N, D_out)
    assert jnp.allclose(out_fast, ref, atol=1e-5, rtol=1e-5), "fast-path mismatch"

    # 2) Hidden-dim tiled fallback (exercised explicitly for coverage).
    out_tiled = jax.block_until_ready(
        mlp_pallas(x, w1, b1, w2, b2, force_path="tiled"))
    assert jnp.allclose(out_tiled, ref, atol=1e-5, rtol=1e-5), "tiled-path mismatch"

    print("KERNEL_OK")
</pallas_src>

<mosaic_0001>
module attributes {stable_mosaic.version = 11 : i64} {
  func.func @_mlp_kernel_resident(%arg0: i32, %arg1: memref<16x32xf32, #tpu.memory_space<vmem>>, %arg2: memref<32x64xf32, #tpu.memory_space<vmem>>, %arg3: memref<1x64xf32, #tpu.memory_space<vmem>>, %arg4: memref<64x32xf32, #tpu.memory_space<vmem>>, %arg5: memref<1x32xf32, #tpu.memory_space<vmem>>, %arg6: memref<16x32xf32, #tpu.memory_space<vmem>>) attributes {dimension_semantics = [#tpu.dimension_semantics<parallel>], iteration_bounds = array<i64: 1>, scalar_prefetch = 0 : i64, scratch_operands = 0 : i64, tpu.core_type = #tpu.core_type<tc>, window_params = [{transform_indices = @transform_0, window_bounds = array<i64: 16, 32>}, {pipeline_mode = #tpu.pipeline_mode<synchronous>, transform_indices = @transform_1, window_bounds = array<i64: 32, 64>}, {pipeline_mode = #tpu.pipeline_mode<synchronous>, transform_indices = @transform_2, window_bounds = array<i64: 1, 64>}, {pipeline_mode = #tpu.pipeline_mode<synchronous>, transform_indices = @transform_3, window_bounds = array<i64: 64, 32>}, {pipeline_mode = #tpu.pipeline_mode<synchronous>, transform_indices = @transform_4, window_bounds = array<i64: 1, 32>}, {transform_indices = @transform_5, window_bounds = array<i64: 16, 32>}]} {
    %c0 = arith.constant 0 : index
    %c0_0 = arith.constant 0 : index
    %0 = vector.load %arg1[%c0, %c0_0] : memref<16x32xf32, #tpu.memory_space<vmem>>, vector<16x32xf32>
    %c0_1 = arith.constant 0 : index
    %c0_2 = arith.constant 0 : index
    %1 = vector.load %arg2[%c0_1, %c0_2] : memref<32x64xf32, #tpu.memory_space<vmem>>, vector<32x64xf32>
    %cst = arith.constant dense<0.000000e+00> : vector<16x64xf32>
    %2 = tpu.matmul %0, %1, %cst {dimension_numbers = #tpu.dot_dimension_numbers<[1], [0], [0], [1], [0, 0, 1, 1], [], []>} : vector<16x32xf32>, vector<32x64xf32>, vector<16x64xf32> -> vector<16x64xf32>
    %c0_3 = arith.constant 0 : index
    %c0_4 = arith.constant 0 : index
    %3 = vector.load %arg3[%c0_3, %c0_4] : memref<1x64xf32, #tpu.memory_space<vmem>>, vector<1x64xf32>
    %4 = vector.broadcast %3 : vector<1x64xf32> to vector<16x64xf32>
    %5 = arith.addf %2, %4 : vector<16x64xf32>
    %cst_5 = arith.constant 5.000000e-01 : f32
    %6 = vector.broadcast %cst_5 : f32 to vector<16x64xf32>
    %7 = arith.mulf %6, %5 : vector<16x64xf32>
    %cst_6 = arith.constant 0.707106769 : f32
    %8 = vector.broadcast %cst_6 : f32 to vector<16x64xf32>
    %9 = arith.mulf %5, %8 : vector<16x64xf32>
    %10 = math.erf %9 : vector<16x64xf32>
    %cst_7 = arith.constant 1.000000e+00 : f32
    %11 = vector.broadcast %cst_7 : f32 to vector<16x64xf32>
    %12 = arith.addf %11, %10 : vector<16x64xf32>
    %13 = arith.mulf %7, %12 : vector<16x64xf32>
    %c0_8 = arith.constant 0 : index
    %c0_9 = arith.constant 0 : index
    %14 = vector.load %arg4[%c0_8, %c0_9] : memref<64x32xf32, #tpu.memory_space<vmem>>, vector<64x32xf32>
    %cst_10 = arith.constant dense<0.000000e+00> : vector<16x32xf32>
    %15 = tpu.matmul %13, %14, %cst_10 {dimension_numbers = #tpu.dot_dimension_numbers<[1], [0], [0], [1], [0, 0, 1, 1], [], []>} : vector<16x64xf32>, vector<64x32xf32>, vector<16x32xf32> -> vector<16x32xf32>
    %c0_11 = arith.constant 0 : index
    %c0_12 = arith.constant 0 : index
    %16 = vector.load %arg5[%c0_11, %c0_12] : memref<1x32xf32, #tpu.memory_space<vmem>>, vector<1x32xf32>
    %17 = vector.broadcast %16 : vector<1x32xf32> to vector<16x32xf32>
    %18 = arith.addf %15, %17 : vector<16x32xf32>
    %c0_13 = arith.constant 0 : index
    %c0_14 = arith.constant 0 : index
    %19 = vector.load %arg6[%c0_13, %c0_14] : memref<16x32xf32, #tpu.memory_space<vmem>>, vector<16x32xf32>
    tpu.vector_store %arg6[%c0_13, %c0_14], %18 {strides = array<i32>} : memref<16x32xf32, #tpu.memory_space<vmem>>, vector<16x32xf32>,
    return
  }
  func.func @transform_0(%arg0: i32) -> (i32, i32) {
    %c0_i32 = arith.constant 0 : i32
    %c0_i32_0 = arith.constant 0 : i32
    return %arg0, %c0_i32 : i32, i32
  }
  func.func @transform_1(%arg0: i32) -> (i32, i32) {
    %c0_i32 = arith.constant 0 : i32
    %c0_i32_0 = arith.constant 0 : i32
    %c0_i32_1 = arith.constant 0 : i32
    return %c0_i32, %c0_i32_0 : i32, i32
  }
  func.func @transform_2(%arg0: i32) -> (i32, i32) {
    %c0_i32 = arith.constant 0 : i32
    %c0_i32_0 = arith.constant 0 : i32
    %c0_i32_1 = arith.constant 0 : i32
    return %c0_i32, %c0_i32_0 : i32, i32
  }
  func.func @transform_3(%arg0: i32) -> (i32, i32) {
    %c0_i32 = arith.constant 0 : i32
    %c0_i32_0 = arith.constant 0 : i32
    %c0_i32_1 = arith.constant 0 : i32
    return %c0_i32, %c0_i32_0 : i32, i32
  }
  func.func @transform_4(%arg0: i32) -> (i32, i32) {
    %c0_i32 = arith.constant 0 : i32
    %c0_i32_0 = arith.constant 0 : i32
    %c0_i32_1 = arith.constant 0 : i32
    return %c0_i32, %c0_i32_0 : i32, i32
  }
  func.func @transform_5(%arg0: i32) -> (i32, i32) {
    %c0_i32 = arith.constant 0 : i32
    %c0_i32_0 = arith.constant 0 : i32
    return %arg0, %c0_i32 : i32, i32
  }
}

</mosaic_0001>

<bundles_post_ra>
// kernel: tpu_custom_call.1
= control target key start
LH: loop header
LB: loop body
LE: loop exit
PB: predicated region body
PF: predicated region fallthrough
CT: control target
= control target key end

     0   :  { %vm34_vm0 = vcmask 261120   ;;  %s445_s0 = inlined_call_operand.vmem [shape: f32[16,32], index: 0, kind: input, shape index: {}]   ;;  %s446_s1 = inlined_call_operand.vmem [shape: f32[32,64], index: 1, kind: input, shape index: {}]   ;;  %s447_s2 = inlined_call_operand.vmem [shape: f32[1,64], index: 2, kind: input, shape index: {}]   ;;  %s448_s3 = inlined_call_operand.vmem [shape: f32[64,32], index: 3, kind: input, shape index: {}]   ;;  %s449_s4 = inlined_call_operand.vmem [shape: f32[1,32], index: 4, kind: input, shape index: {}]   ;;  %s450_s5 = inlined_call_operand.hbm [shape: f32[16,32], index: 5, kind: output, shape index: {}]  }
   0x1   :  { %v23_v0 = vld [vmem:[%s446_s1] sm:$0xff]  ;;  %v24_v1 = vld [vmem:[%s446_s1 + $0x8] sm:$0xff]  ;;  %v25_v2 = vld [vmem:[%s446_s1 + $0x10] sm:$0xff] }
   0x2   :  { %v293_v3 = vpack.c.bf16 %v24_v1, %v23_v0  ;;  %v26_v4 = vld [vmem:[%s446_s1 + $0x18] sm:$0xff]  ;;  %v21_v5 = vld [vmem:[%s445_s0] sm:$0xff] }
   0x3   :  { %v297_v6 = vpack.c.bf16 %v26_v4, %v25_v2  ;;  %271 = vmatprep.mubr.msk.f32.mxu0 %vm34_vm0, %v21_v5 }
   0x4   :  { %10 = vsyncpa [#allocation3], 0  ;;  %294 = vmatprep.subr.bf16.mxu0 %v293_v3  ;;  %v22_v7 = vld [vmem:[%s445_s0 + $0x8] sm:$0xff]  ;;  %v126_v8 = vld [vmem:[%s448_s3] sm:$0xff]  ;;  %vm141_vm1 = vcmask 523264   ;;  %s348_s21 = smov [#allocation2]  }
   0x5   :  { %296 = vmatpush3.bf16.msra.mxu0 %v293_v3  ;;  %v127_v9 = vld [vmem:[%s448_s3 + $0x8] sm:$0xff]  ;;  %v128_v11 = vld [vmem:[%s448_s3 + $0x10] sm:$0xff]  ;;  %v129_v12 = vld [vmem:[%s448_s3 + $0x18] sm:$0xff]  ;;  %s230_s22 = sshll.u32 %s348_s21, 4  ;;  %s231_s22 = int_to_ptr.vmem [resolvable:$true] %s230_s22 }
   0x6   :  { %298 = vmatprep.subr.bf16.mxu0 %v297_v6  ;;  %v301_v10 = vpack.c.bf16 %v127_v9, %v126_v8  ;;  %v305_v13 = vpack.c.bf16 %v129_v12, %v128_v11  ;;  %v130_v14 = vld [vmem:[%s448_s3 + $0x20] sm:$0xff]  ;;  %v131_v15 = vld [vmem:[%s448_s3 + $0x28] sm:$0xff]  ;;  %v132_v17 = vld [vmem:[%s448_s3 + $0x30] sm:$0xff]  ;;  %s324_s23 = scalar_lea.vmem %s231_s22, 256  ;;  %p329_p1 = scmp.lt.s32.totalorder %s231_s22, %s231_s22 }
   0x7   :  { %v309_v16 = vpack.c.bf16 %v131_v15, %v130_v14  ;;  %v133_v18 = vld [vmem:[%s448_s3 + $0x38] sm:$0xff]  ;;  %v241_v20 = vld [vmem:[%s447_s2] ss:$0 sm:$0xff]  ;;  %p325_p0 = scmp.ne.s32.totalorder %s231_s22, %s324_s23  ;;  %p330_p2 = scmp.lt.s32.totalorder %s324_s23, %s324_s23 }
   0x8   :  { %302 = vmatprep.subr.bf16.mxu1 %v301_v10  ;;  %v313_v19 = vpack.c.bf16 %v133_v18, %v132_v17  ;;  %v244_v35 = vld [vmem:[%s449_s4] ss:$0 sm:$0xff] }
   0x9   :  { %300 = vmatpush3.bf16.msra.mxu0 %v297_v6  ;;  %304 = vmatpush3.bf16.msra.mxu1 %v301_v10  ;;  %p331_p3 = por %p330_p2, %p329_p1 }
   0xa   :  { %306 = vmatprep.subr.bf16.mxu1 %v305_v13 }
   0xb   :  { %p332_p4 = pnand %p331_p3, %p325_p0 }
   0xc   :  { %272 = vmatmul.mubr.msk.f32.vlgmr.msra.gmra.mrb[0].mxu0 %vm34_vm0, %v22_v7 }
   0xd   :  { %308 = vmatpush3.bf16.msra.mxu1 %v305_v13 }
   0xe   :  { %310 = vmatprep.subr.bf16.mxu1 %v309_v16 }
  0x11   :  { %312 = vmatpush3.bf16.msra.mxu1 %v309_v16 }
  0x12   :  { %314 = vmatprep.subr.bf16.mxu1 %v313_v19 }
  0x15   :  { %316 = vmatpush3.bf16.msra.mxu1 %v313_v19 }
  0xdf   :  { %v273_v21 = vpop.f32.mrb[0].mxu0 }
  0xe0   :  { %v113_v22 = vadd.f32 %v273_v21, %v241_v20  ;;  %v107_v23 = vpop.f32.mrb[1].mxu0 }
  0xe1   :  { %v108_v24 = vadd.f32 %v241_v20, %v107_v23 }
  0xe2   :  { %v119_v25 = vmul.f32 0.70710677, %v113_v22  ;;  %v117_v32 = vmul.f32 0.5, %v113_v22 }
  0xe3   :  { %v118_v26 = vmul.f32 0.70710677, %v108_v24  ;;  %v116_v30 = vmul.f32 0.5, %v108_v24 }
  0xe4   :  { %320 = verf.f32 %v119_v25 }
  0xe5   :  { %322 = verf.f32 %v118_v26 }
  0xee   :  { %v321_v27 = vpop.eup %320 }
  0xef   :  { %v323_v28 = vpop.eup %322  ;;  %v123_v29 = vadd.f32 1.0, %v321_v27 }
  0xf0   :  { %v122_v31 = vadd.f32 1.0, %v323_v28 }
  0xf1   :  { %v125_v34 = vmul.f32 %v123_v29, %v117_v32 }
  0xf2   :  { %v124_v33 = vmul.f32 %v122_v31, %v116_v30 }
  0xf4   :  { %290 = vmatprep.mubr.msk.f32.mxu1 %vm141_vm1, %v124_v33 }
  0xf5   :  { %291 = vmatmul.mubr.msk.f32.vlgmr.msra.gmra.mrb[0].mxu1 %vm141_vm1, %v125_v34 }
 0x1c8   :  { %v292_v36 = vpop.f32.mrb[0].mxu1 }
 0x1c9   :  { %v220_v37 = vadd.f32 %v292_v36, %v244_v35  ;;  %v214_v38 = vpop.f32.mrb[1].mxu1 }
 0x1ca   :  { %v215_v39 = vadd.f32 %v244_v35, %v214_v38 }
 0x1cb   :  { %224 = vst.msk [vmem:[#allocation2 + $0x8] sm:$0xff] %vm34_vm0, %v220_v37 }
 0x1cc   :  { %223 = vst.msk [vmem:[#allocation2] sm:$0xff] %vm34_vm0, %v215_v39 }
 0x1cd   :  { %335 = shalt.err (!%p332_p4)
}
 0x1ce   :  { %s336_s25 = scalar_lea.hbm %s450_s5, 256 }
 0x1cf   :  { %p337_p5 = scmp.ne.s32.totalorder %s450_s5, %s336_s25  ;;  %p340_p6 = scmp.lt.u32.totalorder %s336_s25, %s450_s5 }
 0x1d1   :  { %p342_p7 = pnand %p340_p6, %p337_p5 }
 0x1d3   :  { %345 = shalt.err (!%p342_p7)
}
 0x1d4   :  { %s349_s30 = smov 128   ;;  %s350_s1 = smov 8  }
 0x1d5   :  { %236 = dma.vmem_to_hbm [thread:$0]  %s231_s22, 256, %s450_s5, [#allocation3], %s349_s30, %s349_s30, %s350_s1  }
 0x1d6   :  { %346 = dma.done.wait [#allocation3], 256  }
 0x1d7   :  { %347 = vsyncadd [#allocation3], 4294967040 }
 0x1d8   :  { %240 = vsyncpa [#allocation3], 1 }

</bundles_post_ra>
